<compile_context>
chip_gen: v7x
topology: tpu7x:2x2x1
jax: 0.10.0
libtpu: 0.0.40
codegen_flags: <defaults>
</compile_context>

<pallas_src>
import functools
import itertools
import math

import numpy as np
import jax
import jax.numpy as jnp
from jax.experimental import pallas as pl
from jax.experimental.pallas import tpu as pltpu

# ----------------------------------------------------------------------------
# Global kernel configuration
# ----------------------------------------------------------------------------
DTYPE = jnp.bfloat16            # activations / weights (f32 accumulation on the MXU)
TM = 256                        # matmul row tile (v6e/v7x MXU is 2x256x256)
MAX_TK = 2048                   # max K chunk per grid step (bounds per-block VMEM)
VMEM_LIMIT = 48 * 1024 * 1024   # <= 48 MiB: leaves headroom on v7x (64 MiB / TC)

# res2net50_v1b_26w_4s configuration
BASE_WIDTH, SCALE, EXPANSION = 26, 4, 4
LAYER_BLOCKS_2D = [3, 4, 6, 3]
LAYER_PLANES_2D = [64, 128, 256, 512]

# 3D ResNet-18 (MedicalNet layout): (planes, blocks, stride, dilation)
LAYER_CFG_3D = [(64, 2, 1, 1), (128, 2, 2, 1), (256, 2, 1, 2), (512, 2, 1, 4)]
POOL3D_OUT = (2, 2, 4)          # adaptive avgpool bins -> 512 * 16 = 8192 features


def _pick_tk(K):
    """K-chunk size: full K when small, else the largest 128-aligned divisor <= MAX_TK."""
    if K <= MAX_TK:
        return K
    for tk in range(MAX_TK, 127, -1):
        if K % tk == 0 and tk % 128 == 0:
            return tk
    return K  # fallback: single (large) chunk


# ----------------------------------------------------------------------------
# Pallas kernels (cached builders)
# ----------------------------------------------------------------------------
@functools.lru_cache(maxsize=None)
def _mm_call(M, K, N, tm, tk, relu, has_res, out_dtype_name):
    """Fused (X @ W) * bn_scale + bn_shift [+ residual] [-> ReLU].

    Grid = (cdiv(M, tm), K // tk): parallel row tiles x K-reduction axis with an f32
    VMEM accumulator (init on k == 0, epilogue + store on the last k).  Ragged last
    row tiles rely on Pallas block masking, so X / residual are never padded in HBM.
    """
    out_dtype = jnp.dtype(out_dtype_name)
    kb = K // tk
    last_k = kb - 1

    def kernel(*refs):
        if has_res:
            x_ref, w_ref, s_ref, b_ref, r_ref, o_ref, acc_ref = refs
        else:
            x_ref, w_ref, s_ref, b_ref, o_ref, acc_ref = refs
            r_ref = None

        @pl.when(pl.program_id(1) == 0)
        def _init():
            acc_ref[...] = jnp.zeros_like(acc_ref)

        acc_ref[...] += jnp.dot(x_ref[...], w_ref[...],
                                preferred_element_type=jnp.float32)

        @pl.when(pl.program_id(1) == last_k)
        def _epilogue():
            y = acc_ref[...] * s_ref[...] + b_ref[...]
            if has_res:
                y = y + r_ref[...].astype(jnp.float32)
            if relu:
                y = jnp.maximum(y, 0.0)
            o_ref[...] = y.astype(out_dtype)

    in_specs = [
        pl.BlockSpec((tm, tk), lambda i, k: (i, k)),
        pl.BlockSpec((tk, N), lambda i, k: (k, 0)),
        pl.BlockSpec((1, N), lambda i, k: (0, 0)),
        pl.BlockSpec((1, N), lambda i, k: (0, 0)),
    ]
    if has_res:
        in_specs.append(pl.BlockSpec((tm, N), lambda i, k: (i, 0)))

    call = pl.pallas_call(
        kernel,
        out_shape=jax.ShapeDtypeStruct((M, N), out_dtype),
        grid=(pl.cdiv(M, tm), kb),
        in_specs=in_specs,
        out_specs=pl.BlockSpec((tm, N), lambda i, k: (i, 0)),
        scratch_shapes=[pltpu.VMEM((tm, N), jnp.float32)],
        compiler_params=pltpu.CompilerParams(
            dimension_semantics=("parallel", "arbitrary"),
            vmem_limit_bytes=VMEM_LIMIT),
    )
    return jax.jit(call)


@functools.lru_cache(maxsize=None)
def _conv3x3_call(B, Hp, Wp, C, Cout):
    """Direct stride-1 3x3 conv + folded BN + ReLU (one padded image per grid step).

    The 9 taps are accumulated in-kernel in f32 from the resident VMEM slab, so the
    9x im2col matrix never touches HBM (main HBM-traffic fix from the review).
    """
    Ho, Wo = Hp - 2, Wp - 2

    def kernel(x_ref, w_ref, s_ref, b_ref, o_ref):
        x = x_ref[0]                                        # (Hp, Wp, C)
        acc = jnp.zeros((Ho * Wo, Cout), jnp.float32)
        for di in range(3):
            for dj in range(3):
                patch = x[di:di + Ho, dj:dj + Wo, :].reshape(Ho * Wo, C)
                acc = acc + jnp.dot(patch, w_ref[di, dj],
                                    preferred_element_type=jnp.float32)
        y = jnp.maximum(acc * s_ref[...] + b_ref[...], 0.0)
        o_ref[0] = y.reshape(Ho, Wo, Cout).astype(o_ref.dtype)

    call = pl.pallas_call(
        kernel,
        out_shape=jax.ShapeDtypeStruct((B, Ho, Wo, Cout), DTYPE),
        grid=(B,),
        in_specs=[
            pl.BlockSpec((1, Hp, Wp, C), lambda n: (n, 0, 0, 0)),
            pl.BlockSpec((3, 3, C, Cout), lambda n: (0, 0, 0, 0)),
            pl.BlockSpec((1, Cout), lambda n: (0, 0)),
            pl.BlockSpec((1, Cout), lambda n: (0, 0)),
        ],
        out_specs=pl.BlockSpec((1, Ho, Wo, Cout), lambda n: (n, 0, 0, 0)),
        compiler_params=pltpu.CompilerParams(
            dimension_semantics=("parallel",),
            vmem_limit_bytes=VMEM_LIMIT),
    )
    return jax.jit(call)


@functools.lru_cache(maxsize=None)
def _pool_call(M, tm, kk, C, mode):
    """Reduce the kk window/bin axis of (M, kk, C) patches (max or mean, f32 sum)."""

    def kernel(x_ref, o_ref):
        x = x_ref[...]
        if mode == "max":
            o_ref[...] = jnp.max(x, axis=1).astype(o_ref.dtype)
        else:
            o_ref[...] = (jnp.sum(x.astype(jnp.float32), axis=1)
                          * (1.0 / kk)).astype(o_ref.dtype)

    call = pl.pallas_call(
        kernel,
        out_shape=jax.ShapeDtypeStruct((M, C), DTYPE),
        grid=(pl.cdiv(M, tm),),
        in_specs=[pl.BlockSpec((tm, kk, C), lambda i: (i, 0, 0))],
        out_specs=pl.BlockSpec((tm, C), lambda i: (i, 0)),
        compiler_params=pltpu.CompilerParams(
            dimension_semantics=("parallel",),
            vmem_limit_bytes=VMEM_LIMIT),
    )
    return jax.jit(call)


@functools.lru_cache(maxsize=None)
def _ce_call(B, C):
    """Cross-entropy loss (mean over batch) from f32 logits + one-hot labels."""

    def kernel(z_ref, y_ref, o_ref):
        z = z_ref[...].astype(jnp.float32)                       # (B, C)
        m = jnp.max(z, axis=1, keepdims=True)
        lse = jnp.log(jnp.sum(jnp.exp(z - m), axis=1, keepdims=True)) + m
        per = (lse - z) * y_ref[...]
        row = jnp.sum(per, axis=1, keepdims=True)                # (B, 1)
        o_ref[...] = jnp.sum(row, axis=0, keepdims=True) * (1.0 / B)

    call = pl.pallas_call(
        kernel,
        out_shape=jax.ShapeDtypeStruct((1, 1), jnp.float32),
        grid=(1,),
        in_specs=[pl.BlockSpec((B, C), lambda i: (0, 0)),
                  pl.BlockSpec((B, C), lambda i: (0, 0))],
        out_specs=pl.BlockSpec((1, 1), lambda i: (0, 0)),
        compiler_params=pltpu.CompilerParams(vmem_limit_bytes=VMEM_LIMIT),
    )
    return jax.jit(call)


# ----------------------------------------------------------------------------
# Thin JAX wrappers (glue: padding / reshapes / dispatch)
# ----------------------------------------------------------------------------
def matmul_bn_act(X, W, scale, shift, relu, residual=None, out_dtype=DTYPE):
    M, K = X.shape
    N = W.shape[1]
    tm = min(TM, M)
    tk = _pick_tk(K)
    args = [X, W, scale, shift]
    if residual is not None:
        args.append(residual)
    call = _mm_call(M, K, N, tm, tk, bool(relu), residual is not None,
                    jnp.dtype(out_dtype).name)
    return call(*args)


def _conv_im2col(x, w, scale, shift, stride, dilation, relu, residual):
    """Generic N-D conv via patch extraction (glue) + fused Pallas matmul.

    Used only for strided 3x3 2D convs and the 3D convs.
    # TODO(synk): a direct tap-accumulation kernel (like the stride-1 2D path) would
    # remove the k^d HBM inflation here as well.
    """
    spatial = x.shape[1:-1]
    B, cin, cout = x.shape[0], w.shape[-2], w.shape[-1]
    ks = w.shape[:-2]
    pads = [dilation * (k - 1) // 2 for k in ks]
    outs = [(s + 2 * p - dilation * (k - 1) - 1) // stride + 1
            for s, p, k in zip(spatial, pads, ks)]
    xp = jnp.pad(x, ((0, 0),) + tuple((p, p) for p in pads) + ((0, 0),))
    cols = []
    for taps in itertools.product(*[range(k) for k in ks]):
        sl = [slice(None)]
        for t, o in zip(taps, outs):
            start = t * dilation
            sl.append(slice(start, start + (o - 1) * stride + 1, stride))
        sl.append(slice(None))
        cols.append(xp[tuple(sl)])
    M = B * int(np.prod(outs))
    X = jnp.concatenate(cols, axis=-1).reshape(M, int(np.prod(ks)) * cin)
    Wm = w.reshape(int(np.prod(ks)) * cin, cout)
    res2 = None if residual is None else residual.reshape(M, cout)
    y = matmul_bn_act(X, Wm, scale, shift, relu, res2)
    return y.reshape((B,) + tuple(outs) + (cout,))


def conv2d_bn_act(x, w, scale, shift, stride=1, relu=True, residual=None):
    """x: NHWC bf16, w: HWIO bf16, padding = (k-1)//2, fused BN (+res) (+ReLU)."""
    kh, kw, cin, cout = w.shape
    if kh == 1 and kw == 1:
        assert stride == 1
        B, H, Wd, _ = x.shape
        res2 = None if residual is None else residual.reshape(B * H * Wd, cout)
        y = matmul_bn_act(x.reshape(B * H * Wd, cin), w.reshape(cin, cout),
                          scale, shift, relu, res2)
        return y.reshape(B, H, Wd, cout)
    if kh == 3 and kw == 3 and stride == 1 and residual is None and relu:
        B, H, Wd, _ = x.shape
        xp = jnp.pad(x, ((0, 0), (1, 1), (1, 1), (0, 0)))
        return _conv3x3_call(B, H + 2, Wd + 2, cin, cout)(xp, w, scale, shift)
    return _conv_im2col(x, w, scale, shift, stride, 1, relu, residual)


def conv3d_bn_act(x, w, scale, shift, stride=1, dilation=1, relu=True, residual=None):
    return _conv_im2col(x, w, scale, shift, stride, dilation, relu, residual)


def pool_reduce(P, mode):
    M, kk, C = P.shape
    return _pool_call(M, min(TM, M), kk, C, mode)(P)


def pool_nd(x, k, stride, pad, mode):
    """Max/avg pool (channels-last, any spatial rank) via patch extraction + Pallas
    window reduction.  AvgPool divides by k^d (count_include_pad=True); MaxPool pads
    with -inf.
    # TODO(synk): ceil_mode for odd spatial sizes is not implemented (test dims are even).
    """
    if k == 1 and stride == 1 and pad == 0:
        return x
    spatial = x.shape[1:-1]
    B, C = x.shape[0], x.shape[-1]
    pv = float("-inf") if mode == "max" else 0.0
    xp = jnp.pad(x, ((0, 0),) + ((pad, pad),) * len(spatial) + ((0, 0),),
                 constant_values=pv)
    outs = [(s + 2 * pad - k) // stride + 1 for s in spatial]
    cols = []
    for taps in itertools.product(range(k), repeat=len(spatial)):
        sl = [slice(None)]
        for t, o in zip(taps, outs):
            sl.append(slice(t, t + (o - 1) * stride + 1, stride))
        sl.append(slice(None))
        cols.append(xp[tuple(sl)])
    M = B * int(np.prod(outs))
    P = jnp.stack(cols, axis=-2).reshape(M, k ** len(spatial), C)
    out = pool_reduce(P, mode)
    return out.reshape((B,) + tuple(outs) + (C,))


def global_avgpool2d(x):
    B, H, W, C = x.shape
    return pool_reduce(x.reshape(B, H * W, C), "avg")


def adaptive_avgpool3d_flatten(x, out_sz):
    B, D, H, W, C = x.shape
    od, oh, ow = out_sz
    assert D % od == 0 and H % oh == 0 and W % ow == 0, (x.shape, out_sz)
    bd, bh, bw = D // od, H // oh, W // ow
    xr = x.reshape(B, od, bd, oh, bh, ow, bw, C)
    xr = jnp.transpose(xr, (0, 1, 3, 5, 2, 4, 6, 7))
    xr = xr.reshape(B * od * oh * ow, bd * bh * bw, C)
    pooled = pool_reduce(xr, "avg")                     # (B*od*oh*ow, C)
    return pooled.reshape(B, od * oh * ow * C)


# ----------------------------------------------------------------------------
# Deterministic synthetic parameters
# ----------------------------------------------------------------------------
class ParamGen:
    def __init__(self, seed):
        self.key = jax.random.PRNGKey(seed)
        self.count = 0

    def _next(self):
        self.count += 1
        return jax.random.fold_in(self.key, self.count)

    def conv(self, *shape):                       # (*kernel, cin, cout)
        fan_in = int(np.prod(shape[:-1]))
        w = jax.random.normal(self._next(), shape, jnp.float32)
        return (w * np.float32(math.sqrt(2.0 / fan_in))).astype(DTYPE)

    def bn(self, c):
        k1, k2, k3, k4 = jax.random.split(self._next(), 4)
        gamma = jax.random.uniform(k1, (c,), jnp.float32, 0.8, 1.2)
        beta = jax.random.normal(k2, (c,), jnp.float32) * 0.05
        mean = jax.random.normal(k3, (c,), jnp.float32) * 0.05
        var = jax.random.uniform(k4, (c,), jnp.float32, 0.8, 1.2)
        scale = gamma * jax.lax.rsqrt(var + 1e-5)
        shift = beta - mean * scale
        return scale.reshape(1, c), shift.reshape(1, c)

    def linear(self, cin, cout):
        w = jax.random.normal(self._next(), (cin, cout), jnp.float32)
        w = (w * np.float32(1.0 / math.sqrt(cin))).astype(DTYPE)
        b = jax.random.normal(self._next(), (1, cout), jnp.float32) * 0.01
        return w, b


def build_params(num_classes, seed=0):
    pg = ParamGen(seed)
    # --- res2net50_v1b_26w_4s (deep stem) -------------------------------------
    res2net = {"stem": [
        {"w": pg.conv(3, 3, 3, 32), "bn": pg.bn(32)},
        {"w": pg.conv(3, 3, 32, 32), "bn": pg.bn(32)},
        {"w": pg.conv(3, 3, 32, 64), "bn": pg.bn(64)},
    ]}
    inplanes = 64
    layers = []
    for li, (planes, nblk) in enumerate(zip(LAYER_PLANES_2D, LAYER_BLOCKS_2D)):
        layer_stride = 1 if li == 0 else 2
        width = int(math.floor(planes * (BASE_WIDTH / 64.0)))
        blocks = []
        for bi in range(nblk):
            stride = layer_stride if bi == 0 else 1
            blk = {
                "stype": "stage" if bi == 0 else "normal",
                "stride": stride, "width": width,
                "conv1": {"w": pg.conv(1, 1, inplanes, width * SCALE),
                          "bn": pg.bn(width * SCALE)},
                "convs": [{"w": pg.conv(3, 3, width, width), "bn": pg.bn(width)}
                          for _ in range(SCALE - 1)],
                "conv3": {"w": pg.conv(1, 1, width * SCALE, planes * EXPANSION),
                          "bn": pg.bn(planes * EXPANSION)},
            }
            if bi == 0 and (stride != 1 or inplanes != planes * EXPANSION):
                blk["down"] = {"w": pg.conv(1, 1, inplanes, planes * EXPANSION),
                               "bn": pg.bn(planes * EXPANSION)}
            blocks.append(blk)
            if bi == 0:
                inplanes = planes * EXPANSION
        layers.append(blocks)
    res2net["layers"] = layers

    # --- 3D ResNet-18 (MedicalNet layout, shortcut 'A') ------------------------
    resnet3d = {"conv1": {"w": pg.conv(7, 7, 7, 1, 64), "bn": pg.bn(64)}}
    inplanes = 64
    layers3d = []
    for planes, nblk, stride, dilation in LAYER_CFG_3D:
        blocks = []
        for bi in range(nblk):
            s = stride if bi == 0 else 1
            blocks.append({
                "stride": s, "dilation": dilation,
                "conv1": {"w": pg.conv(3, 3, 3, inplanes, planes), "bn": pg.bn(planes)},
                "conv2": {"w": pg.conv(3, 3, 3, planes, planes), "bn": pg.bn(planes)},
            })
            inplanes = planes
        layers3d.append(blocks)
    resnet3d["layers"] = layers3d

    # --- fusion head: Linear(2048 + 8192, classes) ------------------------------
    fc_w, fc_b = pg.linear(2048 + 8192, num_classes)
    fc = {"w": fc_w, "b": fc_b, "scale": jnp.ones((1, num_classes), jnp.float32)}
    return {"res2net": res2net, "resnet3d": resnet3d, "fc": fc}


# ----------------------------------------------------------------------------
# Network forward passes
# ----------------------------------------------------------------------------
def bottle2neck(x, blk):
    # TODO(synk): branch widths (26/52/104/208) under-fill the 128-lane axis; channel
    #             padding / fusing the independent 'stage' branch convs is future work.
    width, stride, stype = blk["width"], blk["stride"], blk["stype"]
    out = conv2d_bn_act(x, blk["conv1"]["w"], *blk["conv1"]["bn"], relu=True)
    spx = [out[..., i * width:(i + 1) * width] for i in range(SCALE)]
    sp = None
    branches = []
    for i in range(SCALE - 1):
        sp = spx[i] if (i == 0 or stype == "stage") else sp + spx[i]
        sp = conv2d_bn_act(sp, blk["convs"][i]["w"], *blk["convs"][i]["bn"],
                           stride=stride, relu=True)
        branches.append(sp)
    if stype == "normal":
        branches.append(spx[SCALE - 1])
    else:   # 'stage': AvgPool2d(3, stride, padding=1) on the last split
        branches.append(pool_nd(spx[SCALE - 1], 3, stride, 1, "avg"))
    out = jnp.concatenate(branches, axis=-1)

    residual = x
    if "down" in blk:
        if stride != 1:   # v1b downsample: AvgPool2d(stride, stride) then 1x1 conv + BN
            residual = pool_nd(residual, stride, stride, 0, "avg")
        residual = conv2d_bn_act(residual, blk["down"]["w"], *blk["down"]["bn"],
                                 relu=False)
    # conv3 + bn3 + residual add + ReLU, all fused in the matmul epilogue
    return conv2d_bn_act(out, blk["conv3"]["w"], *blk["conv3"]["bn"],
                         relu=True, residual=residual)


def res2net2d_forward(p, x_nchw):
    x = jnp.transpose(x_nchw, (0, 2, 3, 1)).astype(DTYPE)        # NHWC, bf16
    s0, s1, s2 = p["stem"]
    x = conv2d_bn_act(x, s0["w"], *s0["bn"], stride=2, relu=True)
    x = conv2d_bn_act(x, s1["w"], *s1["bn"], stride=1, relu=True)
    x = conv2d_bn_act(x, s2["w"], *s2["bn"], stride=1, relu=True)
    x = pool_nd(x, 3, 2, 1, "max")                               # maxpool 3x3 s2 p1
    for blocks in p["layers"]:
        for blk in blocks:
            x = bottle2neck(x, blk)
    return global_avgpool2d(x)                                   # (B, 2048)


def basic_block3d(x, blk):
    s, d = blk["stride"], blk["dilation"]
    cout = blk["conv2"]["w"].shape[-1]
    out = conv3d_bn_act(x, blk["conv1"]["w"], *blk["conv1"]["bn"],
                        stride=s, dilation=d, relu=True)
    residual = x
    cin = x.shape[-1]
    if s != 1 or cin != cout:            # shortcut type 'A' (parameter-free)
        if s != 1:
            residual = residual[:, ::s, ::s, ::s, :]
        if cout > cin:
            residual = jnp.pad(residual, ((0, 0),) * 4 + ((0, cout - cin),))
    return conv3d_bn_act(out, blk["conv2"]["w"], *blk["conv2"]["bn"],
                         stride=1, dilation=d, relu=True, residual=residual)


def resnet3d_forward(p, x_ncdhw):
    x = jnp.transpose(x_ncdhw, (0, 2, 3, 4, 1)).astype(DTYPE)    # NDHWC, bf16
    x = conv3d_bn_act(x, p["conv1"]["w"], *p["conv1"]["bn"],
                      stride=2, dilation=1, relu=True)           # 7x7x7 s2 p3
    x = pool_nd(x, 3, 2, 1, "max")                               # maxpool3d 3 s2 p1
    for blocks in p["layers"]:
        for blk in blocks:
            x = basic_block3d(x, blk)
    return adaptive_avgpool3d_flatten(x, POOL3D_OUT)             # (B, 8192)


def multi_ensemble_forward(params, X, y):
    feat2d = res2net2d_forward(params["res2net"], X[0])          # (B, 2048)
    feat3d = resnet3d_forward(params["resnet3d"], X[1])          # (B, 8192)
    feats = jnp.concatenate([feat2d, feat3d], axis=1).astype(DTYPE)
    pred = matmul_bn_act(feats, params["fc"]["w"], params["fc"]["scale"],
                         params["fc"]["b"], relu=False, out_dtype=jnp.float32)
    onehot = jax.nn.one_hot(y, pred.shape[1], dtype=jnp.float32)
    loss = _ce_call(pred.shape[0], pred.shape[1])(pred, onehot)[0, 0]
    return pred, loss


# ----------------------------------------------------------------------------
if __name__ == "__main__":
    B, CLASSES = 2, 4
    key = jax.random.PRNGKey(0)
    k1, k2, k3 = jax.random.split(key, 3)
    # modality 0: fundus image (NCHW); modality 1: OCT volume (NCDHW, 1 channel)
    x2d = jax.random.normal(k1, (B, 3, 32, 32), jnp.float32)
    x3d = jax.random.normal(k2, (B, 1, 16, 32, 32), jnp.float32)
    y = jax.random.randint(k3, (B,), 0, CLASSES)

    params = build_params(CLASSES, seed=0)
    pred, loss = multi_ensemble_forward(params, [x2d, x3d], y)
    pred, loss = jax.block_until_ready((pred, loss))

    assert pred.shape == (B, CLASSES), pred.shape
    assert np.all(np.isfinite(np.asarray(pred, dtype=np.float32)))
    assert np.isfinite(float(loss))
    print("KERNEL_OK")
</pallas_src>

<mosaic_0001>
module attributes {stable_mosaic.version = 11 : i64} {
  func.func @kernel(%arg0: i32, %arg1: i32, %arg2: memref<256x27xbf16, #tpu.memory_space<vmem>>, %arg3: memref<27x32xbf16, #tpu.memory_space<vmem>>, %arg4: memref<1x32xf32, #tpu.memory_space<vmem>>, %arg5: memref<1x32xf32, #tpu.memory_space<vmem>>, %arg6: memref<256x32xbf16, #tpu.memory_space<vmem>>, %arg7: memref<256x32xf32, #tpu.memory_space<vmem>>) attributes {dimension_semantics = [#tpu.dimension_semantics<parallel>, #tpu.dimension_semantics<arbitrary>], iteration_bounds = array<i64: 2, 1>, scalar_prefetch = 0 : i64, scratch_operands = 1 : i64, tpu.core_type = #tpu.core_type<tc>, window_params = [{transform_indices = @transform_0, window_bounds = array<i64: 256, 27>}, {transform_indices = @transform_1, window_bounds = array<i64: 27, 32>}, {pipeline_mode = #tpu.pipeline_mode<synchronous>, transform_indices = @transform_2, window_bounds = array<i64: 1, 32>}, {pipeline_mode = #tpu.pipeline_mode<synchronous>, transform_indices = @transform_3, window_bounds = array<i64: 1, 32>}, {transform_indices = @transform_4, window_bounds = array<i64: 256, 32>}]} {
    %c0_i32 = arith.constant 0 : i32
    %0 = arith.cmpi eq, %arg1, %c0_i32 : i32
    %1 = arith.extui %0 : i1 to i32
    %c0_i32_0 = arith.constant 0 : i32
    %2 = arith.cmpi ne, %1, %c0_i32_0 : i32
    scf.if %2 {
      %cst_10 = arith.constant 0.000000e+00 : f32
      %12 = vector.broadcast %cst_10 : f32 to vector<256x32xf32>
      %c0_11 = arith.constant 0 : index
      %c0_12 = arith.constant 0 : index
      %13 = vector.load %arg7[%c0_11, %c0_12] : memref<256x32xf32, #tpu.memory_space<vmem>>, vector<256x32xf32>
      tpu.vector_store %arg7[%c0_11, %c0_12], %12 {strides = array<i32>} : memref<256x32xf32, #tpu.memory_space<vmem>>, vector<256x32xf32>,
    } else {
    }
    %c0 = arith.constant 0 : index
    %c0_1 = arith.constant 0 : index
    %3 = vector.load %arg7[%c0, %c0_1] : memref<256x32xf32, #tpu.memory_space<vmem>>, vector<256x32xf32>
    %c0_2 = arith.constant 0 : index
    %c0_3 = arith.constant 0 : index
    %4 = vector.load %arg2[%c0_2, %c0_3] : memref<256x27xbf16, #tpu.memory_space<vmem>>, vector<256x27xbf16>
    %c0_4 = arith.constant 0 : index
    %c0_5 = arith.constant 0 : index
    %5 = vector.load %arg3[%c0_4, %c0_5] : memref<27x32xbf16, #tpu.memory_space<vmem>>, vector<27x32xbf16>
    %cst = arith.constant dense<0.000000e+00> : vector<256x32xf32>
    %6 = tpu.matmul %4, %5, %cst {dimension_numbers = #tpu.dot_dimension_numbers<[1], [0], [0], [1], [0, 0, 1, 1], [], []>} : vector<256x27xbf16>, vector<27x32xbf16>, vector<256x32xf32> -> vector<256x32xf32>
    %7 = arith.addf %3, %6 : vector<256x32xf32>
    %c0_6 = arith.constant 0 : index
    %c0_7 = arith.constant 0 : index
    %8 = vector.load %arg7[%c0_6, %c0_7] : memref<256x32xf32, #tpu.memory_space<vmem>>, vector<256x32xf32>
    tpu.vector_store %arg7[%c0_6, %c0_7], %7 {strides = array<i32>} : memref<256x32xf32, #tpu.memory_space<vmem>>, vector<256x32xf32>,
    %c0_i32_8 = arith.constant 0 : i32
    %9 = arith.cmpi eq, %arg1, %c0_i32_8 : i32
    %10 = arith.extui %9 : i1 to i32
    %c0_i32_9 = arith.constant 0 : i32
    %11 = arith.cmpi ne, %10, %c0_i32_9 : i32
    scf.if %11 {
      %c0_10 = arith.constant 0 : index
      %c0_11 = arith.constant 0 : index
      %12 = vector.load %arg7[%c0_10, %c0_11] : memref<256x32xf32, #tpu.memory_space<vmem>>, vector<256x32xf32>
      %c0_12 = arith.constant 0 : index
      %c0_13 = arith.constant 0 : index
      %13 = vector.load %arg4[%c0_12, %c0_13] : memref<1x32xf32, #tpu.memory_space<vmem>>, vector<1x32xf32>
      %14 = vector.broadcast %13 : vector<1x32xf32> to vector<256x32xf32>
      %15 = arith.mulf %12, %14 : vector<256x32xf32>
      %c0_14 = arith.constant 0 : index
      %c0_15 = arith.constant 0 : index
      %16 = vector.load %arg5[%c0_14, %c0_15] : memref<1x32xf32, #tpu.memory_space<vmem>>, vector<1x32xf32>
      %17 = vector.broadcast %16 : vector<1x32xf32> to vector<256x32xf32>
      %18 = arith.addf %15, %17 : vector<256x32xf32>
      %cst_16 = arith.constant 0.000000e+00 : f32
      %19 = vector.broadcast %cst_16 : f32 to vector<256x32xf32>
      %20 = arith.maximumf %18, %19 : vector<256x32xf32>
      %21 = arith.truncf %20 : vector<256x32xf32> to vector<256x32xbf16>
      %c0_17 = arith.constant 0 : index
      %c0_18 = arith.constant 0 : index
      %22 = vector.load %arg6[%c0_17, %c0_18] : memref<256x32xbf16, #tpu.memory_space<vmem>>, vector<256x32xbf16>
      tpu.vector_store %arg6[%c0_17, %c0_18], %21 {strides = array<i32>} : memref<256x32xbf16, #tpu.memory_space<vmem>>, vector<256x32xbf16>,
    } else {
    }
    return
  }
  func.func @transform_0(%arg0: i32, %arg1: i32) -> (i32, i32) {
    %c0_i32 = arith.constant 0 : i32
    return %arg0, %arg1 : i32, i32
  }
  func.func @transform_1(%arg0: i32, %arg1: i32) -> (i32, i32) {
    %c0_i32 = arith.constant 0 : i32
    %c0_i32_0 = arith.constant 0 : i32
    return %arg1, %c0_i32 : i32, i32
  }
  func.func @transform_2(%arg0: i32, %arg1: i32) -> (i32, i32) {
    %c0_i32 = arith.constant 0 : i32
    %c0_i32_0 = arith.constant 0 : i32
    %c0_i32_1 = arith.constant 0 : i32
    return %c0_i32, %c0_i32_0 : i32, i32
  }
  func.func @transform_3(%arg0: i32, %arg1: i32) -> (i32, i32) {
    %c0_i32 = arith.constant 0 : i32
    %c0_i32_0 = arith.constant 0 : i32
    %c0_i32_1 = arith.constant 0 : i32
    return %c0_i32, %c0_i32_0 : i32, i32
  }
  func.func @transform_4(%arg0: i32, %arg1: i32) -> (i32, i32) {
    %c0_i32 = arith.constant 0 : i32
    %c0_i32_0 = arith.constant 0 : i32
    return %arg0, %c0_i32 : i32, i32
  }
}

</mosaic_0001>

<bundles_post_ra>
// kernel: tpu_custom_call.1
= control target key start
LH: loop header
LB: loop body
LE: loop exit
PB: predicated region body
PF: predicated region fallthrough
CT: control target
= control target key end

     0   :  { %s1379_s15 = smov 0   ;;  %s1381_s16 = smov 0   ;;  %s1700_s0 = inlined_call_operand.vmem [shape: bf16[512,27], index: 0, kind: input, shape index: {}]   ;;  %s1701_s1 = inlined_call_operand.vmem [shape: bf16[27,32], index: 1, kind: input, shape index: {}]   ;;  %s1702_s2 = inlined_call_operand.vmem [shape: f32[1,32], index: 2, kind: input, shape index: {}]   ;;  %s1703_s3 = inlined_call_operand.vmem [shape: f32[1,32], index: 3, kind: input, shape index: {}]   ;;  %s1704_s4 = inlined_call_operand.vmem [shape: bf16[512,32], index: 4, kind: output, shape index: {}]  }
   0x1   :  { %s1383_s17 = smov 0  }
   0x2 LB: > { %s26_s18 = sadd.s32 1, %s1346_s16  ;;  %p1119_p0 = scmp.ge.s32.totalorder %s1350_s17, 1  ;;  %s1350_s17 = sphi %s1383_s17, %s14_s17   ;;  %s1346_s16 = sphi %s1381_s16, %s1707_s16   ;;  %s1342_s15 = sphi %s1379_s15, %s1706_s15  }
   0x3   : > { %p28_p1 = scmp.ge.s32.totalorder %s26_s18, 2  ;;  %p191_p2 = scmp.lt.s32.totalorder %s1350_s17, 3 }
   0x5   : > { %s1709_s18 = smov (%p28_p1, %s26_s18), 0  ;;  %p192_p3 = pnand %p1119_p0, %p191_p2 }
   0x6   : > { %v1310_v0 = vld [vmem:[%s1701_s1] sm:$0xff] (!%p192_p3)   ;;  %vm492_vm0 = vcmask (!%p192_p3), 1044480   ;;  %v1311_v1 = vld [vmem:[%s1701_s1 + $0x8] sm:$0x3f] (!%p192_p3)   ;;  %vm493_vm1 = vcmask (!%p192_p3), 1045504   ;;  %s1120_s23 = sshll.u32 (!%p192_p3), %s1342_s15, 5 }
   0x7   : > { %195 = sbr.rel (%p192_p3) target bundleno = 291 (0x123), region = 36  ;;  %1244 = vmatprep.subr.bf16.mxu0 (!%p192_p3), %v1310_v0  ;;  %1280 = vmatprep.subr.bf16.mxu1 (!%p192_p3), %v1310_v0  ;;  %vm251_vm2 = vcmask (!%p192_p3), 261120   ;;  %v1352_v2 = vmov (!%p192_p3), 65535   ;;  %p1408_p4 = scmp.lt.s32.totalorder (!%p192_p3), %s1120_s23, 63  ;;  %v1353_v5 = vmov (!%p192_p3), 0.0   ;;  %vm443_vm3 = vcmask (!%p192_p3), 220160  }
   0x8   : > { %1245 = vmatpush3.bf16.msra.mxu0 (!%p192_p3), %v1310_v0  ;;  %1282 = vmatpush3.bf16.msra.mxu1 (!%p192_p3), %v1310_v0  ;;  %v494_v3 = vsel (!%p192_p3), %vm492_vm0, 4294967295, %v1352_v2  ;;  %254 = vst.msk [vmem:[#allocation2 + $0x10] sm:$0xff] (!%p192_p3), %vm251_vm2, %v1353_v5  ;;  %252 = vst.msk [vmem:[#allocation2] sm:$0xff] (!%p192_p3), %vm251_vm2, %v1353_v5  ;;  %v1501_v50 = vld [vmem:[%s1702_s2] ss:$0 sm:$0xff] (!%p192_p3)  ;;  %vm998_vm4 = vcmask (!%p192_p3), 257024  }
   0x9   : > { %v495_v4 = vsel (!%p192_p3), %vm493_vm1, %v494_v3, 0  ;;  %253 = vst.msk [vmem:[#allocation2 + $0x8] sm:$0xff] (!%p192_p3), %vm251_vm2, %v1353_v5  ;;  %255 = vst.msk [vmem:[#allocation2 + $0x18] sm:$0xff] (!%p192_p3), %vm251_vm2, %v1353_v5  ;;  %v1506_v60 = vld [vmem:[%s1703_s3] ss:$0 sm:$0xff] (!%p192_p3) }
   0xa   : > { %256 = vst.msk [vmem:[#allocation2 + $0x20] sm:$0xff] (!%p192_p3), %vm251_vm2, %v1353_v5  ;;  %257 = vst.msk [vmem:[#allocation2 + $0x28] sm:$0xff] (!%p192_p3), %vm251_vm2, %v1353_v5  ;;  %v497_v6 = vand.u32 (!%p192_p3), %v1311_v1, %v495_v4 }
   0xb   : > { %258 = vst.msk [vmem:[#allocation2 + $0x30] sm:$0xff] (!%p192_p3), %vm251_vm2, %v1353_v5  ;;  %259 = vst.msk [vmem:[#allocation2 + $0x38] sm:$0xff] (!%p192_p3), %vm251_vm2, %v1353_v5 }
   0xc   : > { %260 = vst.msk [vmem:[#allocation2 + $0x40] sm:$0xff] (!%p192_p3), %vm251_vm2, %v1353_v5  ;;  %261 = vst.msk [vmem:[#allocation2 + $0x48] sm:$0xff] (!%p192_p3), %vm251_vm2, %v1353_v5  ;;  %1246 = vmatprep.subr.bf16.mxu0 (!%p192_p3), %v497_v6  ;;  %1281 = vmatprep.subr.bf16.mxu1 (!%p192_p3), %v497_v6 }
   0xd   : > { %262 = vst.msk [vmem:[#allocation2 + $0x50] sm:$0xff] (!%p192_p3), %vm251_vm2, %v1353_v5  ;;  %263 = vst.msk [vmem:[#allocation2 + $0x58] sm:$0xff] (!%p192_p3), %vm251_vm2, %v1353_v5  ;;  %1247 = vmatpush3.bf16.msra.mxu0 (!%p192_p3), %v497_v6  ;;  %1283 = vmatpush3.bf16.msra.mxu1 (!%p192_p3), %v497_v6 }
   0xe   : > { %264 = vst.msk [vmem:[#allocation2 + $0x60] sm:$0xff] %vm251_vm2, %v1353_v5  ;;  %265 = vst.msk [vmem:[#allocation2 + $0x68] sm:$0xff] %vm251_vm2, %v1353_v5  ;;  %s1711_s23 = smov (!%p1408_p4, %s1120_s23), 63 }
   0xf   : > { %266 = vst.msk [vmem:[#allocation2 + $0x70] sm:$0xff] %vm251_vm2, %v1353_v5  ;;  %267 = vst.msk [vmem:[#allocation2 + $0x78] sm:$0xff] %vm251_vm2, %v1353_v5  ;;  %s1121_s25 = sshll.u32 %s1711_s23, 2  ;;  %v286_v23 = vld [vmem:[#allocation2 + $0x10] sm:$0xff]  ;;  %v284_v25 = vld [vmem:[#allocation2] sm:$0xff] }
  0x10   : > { %268 = vst.msk [vmem:[#allocation2 + $0x80] sm:$0xff] %vm251_vm2, %v1353_v5  ;;  %269 = vst.msk [vmem:[#allocation2 + $0x88] sm:$0xff] %vm251_vm2, %v1353_v5  ;;  %s1456_s28 = scalar_lea.vmem %s1700_s0, %s1121_s25  ;;  %v287_v28 = vld [vmem:[#allocation2 + $0x18] sm:$0xff]  ;;  %v285_v33 = vld [vmem:[#allocation2 + $0x8] sm:$0xff]  ;;  %s1534_s9 = scalar_lea.vmem %s1704_s4, %s1121_s25 }
  0x11   : > { %270 = vst.msk [vmem:[#allocation2 + $0x90] sm:$0xff] %vm251_vm2, %v1353_v5  ;;  %271 = vst.msk [vmem:[#allocation2 + $0x98] sm:$0xff] %vm251_vm2, %v1353_v5  ;;  %v1312_v7 = vld [vmem:[%s1456_s28] sm:$0xff]   ;;  %v1314_v9 = vld [vmem:[%s1456_s28 + $0x8] sm:$0xff]  }
  0x12   : > { %272 = vst.msk [vmem:[#allocation2 + $0xa0] sm:$0xff] %vm251_vm2, %v1353_v5  ;;  %273 = vst.msk [vmem:[#allocation2 + $0xa8] sm:$0xff] %vm251_vm2, %v1353_v5  ;;  %v1313_v8 = vld [vmem:[%s1456_s28 + $0x40] sm:$0xff]   ;;  %1248 = vmatprep.mubr.msk.bf16.mxu0 %vm443_vm3, %v1312_v7  ;;  %v1315_v10 = vld [vmem:[%s1456_s28 + $0x48] sm:$0xff]  }
  0x13   : > { %274 = vst.msk [vmem:[#allocation2 + $0xb0] sm:$0xff] %vm251_vm2, %v1353_v5  ;;  %275 = vst.msk [vmem:[#allocation2 + $0xb8] sm:$0xff] %vm251_vm2, %v1353_v5  ;;  %1264 = vmatprep.mubr.msk.bf16.mxu1 %vm443_vm3, %v1313_v8  ;;  %1249 = vmatmul.mubr.msk.bf16.vlgmr.msra.gmra.mrb[0].mxu0 %vm443_vm3, %v1314_v9  ;;  %v1316_v11 = vld [vmem:[%s1456_s28 + $0x10] sm:$0xff]   ;;  %v1318_v13 = vld [vmem:[%s1456_s28 + $0x18] sm:$0xff]  }
  0x14   : > { %276 = vst.msk [vmem:[#allocation2 + $0xc0] sm:$0xff] %vm251_vm2, %v1353_v5  ;;  %277 = vst.msk [vmem:[#allocation2 + $0xc8] sm:$0xff] %vm251_vm2, %v1353_v5  ;;  %1265 = vmatmul.mubr.msk.bf16.vlgmr.msra.gmra.mrb[0].mxu1 %vm443_vm3, %v1315_v10  ;;  %v1317_v12 = vld [vmem:[%s1456_s28 + $0x50] sm:$0xff]   ;;  %1252 = vmatprep.mubr.msk.bf16.mxu0 %vm443_vm3, %v1316_v11  ;;  %v1319_v14 = vld [vmem:[%s1456_s28 + $0x58] sm:$0xff]  }
  0x15   : > { %278 = vst.msk [vmem:[#allocation2 + $0xd0] sm:$0xff] %vm251_vm2, %v1353_v5  ;;  %279 = vst.msk [vmem:[#allocation2 + $0xd8] sm:$0xff] %vm251_vm2, %v1353_v5  ;;  %1268 = vmatprep.mubr.msk.bf16.mxu1 %vm443_vm3, %v1317_v12  ;;  %v1320_v15 = vld [vmem:[%s1456_s28 + $0x20] sm:$0xff]   ;;  %v1322_v17 = vld [vmem:[%s1456_s28 + $0x28] sm:$0xff]  }
  0x16   : > { %280 = vst.msk [vmem:[#allocation2 + $0xe0] sm:$0xff] %vm251_vm2, %v1353_v5  ;;  %281 = vst.msk [vmem:[#allocation2 + $0xe8] sm:$0xff] %vm251_vm2, %v1353_v5  ;;  %v1321_v16 = vld [vmem:[%s1456_s28 + $0x60] sm:$0xff]   ;;  %v1323_v18 = vld [vmem:[%s1456_s28 + $0x68] sm:$0xff]  }
  0x17   : > { %282 = vst.msk [vmem:[#allocation2 + $0xf0] sm:$0xff] %vm251_vm2, %v1353_v5  ;;  %283 = vst.msk [vmem:[#allocation2 + $0xf8] sm:$0xff] %vm251_vm2, %v1353_v5  ;;  %v1324_v19 = vld [vmem:[%s1456_s28 + $0x30] sm:$0xff]   ;;  %v1326_v21 = vld [vmem:[%s1456_s28 + $0x38] sm:$0xff]  }
  0x18   : > { %v1325_v20 = vld [vmem:[%s1456_s28 + $0x70] sm:$0xff]   ;;  %v1327_v22 = vld [vmem:[%s1456_s28 + $0x78] sm:$0xff]   ;;  %v300_v27 = vld [vmem:[#allocation2 + $0x80] sm:$0xff] }
  0x19   : > { %v302_v24 = vld [vmem:[#allocation2 + $0x90] sm:$0xff]  ;;  %v303_v32 = vld [vmem:[#allocation2 + $0x98] sm:$0xff]  ;;  %v301_v38 = vld [vmem:[#allocation2 + $0x88] sm:$0xff] }
  0x1a   : > { %v290_v47 = vld [vmem:[#allocation2 + $0x30] sm:$0xff]  ;;  %v288_v49 = vld [vmem:[#allocation2 + $0x20] sm:$0xff]  ;;  %v291_v53 = vld [vmem:[#allocation2 + $0x38] sm:$0xff] }
  0x1b   : > { %1253 = vmatmul.mubr.msk.bf16.gmra.mrb[4].mxu0 %vm443_vm3, %v1318_v13  ;;  %v306_v48 = vld [vmem:[#allocation2 + $0xb0] sm:$0xff]  ;;  %v304_v52 = vld [vmem:[#allocation2 + $0xa0] sm:$0xff]  ;;  %v307_v57 = vld [vmem:[#allocation2 + $0xb8] sm:$0xff] }
  0x1c   : > { %1269 = vmatmul.mubr.msk.bf16.gmra.mrb[4].mxu1 %vm443_vm3, %v1319_v14  ;;  %1256 = vmatprep.mubr.msk.bf16.mxu0 %vm443_vm3, %v1320_v15  ;;  %v289_v58 = vld [vmem:[#allocation2 + $0x28] sm:$0xff] }
  0x1d   : > { %1272 = vmatprep.mubr.msk.bf16.mxu1 %vm443_vm3, %v1321_v16  ;;  %v305_v1 = vld [vmem:[#allocation2 + $0xa8] sm:$0xff] }
  0x23   : > { %1257 = vmatmul.mubr.msk.bf16.gmra.mrb[8].mxu0 %vm443_vm3, %v1322_v17 }
  0x24   : > { %1273 = vmatmul.mubr.msk.bf16.gmra.mrb[8].mxu1 %vm443_vm3, %v1323_v18  ;;  %1260 = vmatprep.mubr.msk.bf16.mxu0 %vm443_vm3, %v1324_v19 }
  0x25   : > { %1276 = vmatprep.mubr.msk.bf16.mxu1 %vm443_vm3, %v1325_v20 }
  0x2b   : > { %1261 = vmatmul.mubr.msk.bf16.gmra.mrb[12].mxu0 %vm443_vm3, %v1326_v21 }
  0x2c   : > { %1277 = vmatmul.mubr.msk.bf16.gmra.mrb[12].mxu1 %vm443_vm3, %v1327_v22 }
  0xe6   : > { %v1250_v26 = vpop.f32.mrb[0].mxu0 }
  0xe7   : > { %v662_v29 = vadd.f32 %v1250_v26, %v286_v23  ;;  %v1266_v30 = vpop.f32.mrb[0].mxu1  ;;  %v533_v31 = vpop.f32.mrb[1].mxu0 }
  0xe8   : > { %v678_v34 = vadd.f32 %v1266_v30, %v302_v24  ;;  %v660_v35 = vadd.f32 %v533_v31, %v284_v25  ;;  %v597_v36 = vpop.f32.mrb[1].mxu1  ;;  %v1251_v37 = vpop.f32.mrb[2].mxu0 }
  0xe9   : > { %695 = vst.msk [vmem:[#allocation2 + $0x10] sm:$0xff] %vm251_vm2, %v662_v29  ;;  %v676_v39 = vadd.f32 %v597_v36, %v300_v27  ;;  %v663_v40 = vadd.f32 %v1251_v37, %v287_v28  ;;  %v1267_v41 = vpop.f32.mrb[2].mxu1  ;;  %v536_v42 = vpop.f32.mrb[3].mxu0 }
  0xea   : > { %711 = vst.msk [vmem:[#allocation2 + $0x90] sm:$0xff] %vm251_vm2, %v678_v34  ;;  %693 = vst.msk [vmem:[#allocation2] sm:$0xff] %vm251_vm2, %v660_v35  ;;  %v679_v43 = vadd.f32 %v1267_v41, %v303_v32  ;;  %v661_v44 = vadd.f32 %v536_v42, %v285_v33  ;;  %v600_v45 = vpop.f32.mrb[3].mxu1 }
  0xeb   : > { %709 = vst.msk [vmem:[#allocation2 + $0x80] sm:$0xff] %vm251_vm2, %v676_v39  ;;  %696 = vst.msk [vmem:[#allocation2 + $0x18] sm:$0xff] %vm251_vm2, %v663_v40  ;;  %v677_v46 = vadd.f32 %v600_v45, %v301_v38 }
  0xec   : > { %712 = vst.msk [vmem:[#allocation2 + $0x98] sm:$0xff] %vm251_vm2, %v679_v43  ;;  %694 = vst.msk [vmem:[#allocation2 + $0x8] sm:$0xff] %vm251_vm2, %v661_v44 }
  0xed   : > { %710 = vst.msk [vmem:[#allocation2 + $0x88] sm:$0xff] %vm251_vm2, %v677_v46 }
  0xee   : > { %v1254_v51 = vpop.f32.mrb[4].mxu0 }
  0xef   : > { %v666_v54 = vadd.f32 %v1254_v51, %v290_v47  ;;  %v1270_v55 = vpop.f32.mrb[4].mxu1  ;;  %v549_v56 = vpop.f32.mrb[5].mxu0 }
  0xf0   : > { %v730_v59 = vld [vmem:[#allocation2 + $0x10] sm:$0xff]  ;;  %v682_v61 = vadd.f32 %v1270_v55, %v306_v48  ;;  %v664_v62 = vadd.f32 %v549_v56, %v288_v49  ;;  %v613_v63 = vpop.f32.mrb[5].mxu1  ;;  %v1255_v0 = vpop.f32.mrb[6].mxu0 }
  0xf1   : > { %v769_v2 = vmul.f32 %v1501_v50, %v730_v59  ;;  %v746_v3 = vld [vmem:[#allocation2 + $0x90] sm:$0xff]  ;;  %v728_v4 = vld [vmem:[#allocation2] sm:$0xff]  ;;  %699 = vst.msk [vmem:[#allocation2 + $0x30] sm:$0xff] %vm251_vm2, %v666_v54  ;;  %v680_v5 = vadd.f32 %v613_v63, %v304_v52  ;;  %v667_v6 = vadd.f32 %v1255_v0, %v291_v53  ;;  %v1271_v7 = vpop.f32.mrb[6].mxu1  ;;  %v552_v8 = vpop.f32.mrb[7].mxu0 }
  0xf2   : > { %v785_v9 = vmul.f32 %v1501_v50, %v746_v3  ;;  %v767_v10 = vmul.f32 %v1501_v50, %v728_v4  ;;  %v744_v11 = vld [vmem:[#allocation2 + $0x80] sm:$0xff]  ;;  %v731_v12 = vld [vmem:[#allocation2 + $0x18] sm:$0xff]  ;;  %715 = vst.msk [vmem:[#allocation2 + $0xb0] sm:$0xff] %vm251_vm2, %v682_v61  ;;  %697 = vst.msk [vmem:[#allocation2 + $0x20] sm:$0xff] %vm251_vm2, %v664_v62  ;;  %v683_v13 = vadd.f32 %v1271_v7, %v307_v57  ;;  %v616_v15 = vpop.f32.mrb[7].mxu1 }
  0xf3   : > { %v665_v14 = vadd.f32 %v552_v8, %v289_v58  ;;  %v808_v16 = vadd.f32 %v1506_v60, %v769_v2  ;;  %v783_v17 = vmul.f32 %v1501_v50, %v744_v11  ;;  %v770_v18 = vmul.f32 %v1501_v50, %v731_v12  ;;  %v747_v19 = vld [vmem:[#allocation2 + $0x98] sm:$0xff]  ;;  %v729_v20 = vld [vmem:[#allocation2 + $0x8] sm:$0xff]  ;;  %713 = vst.msk [vmem:[#allocation2 + $0xa0] sm:$0xff] %vm251_vm2, %v680_v5 }
  0xf4   : > { %700 = vst.msk [vmem:[#allocation2 + $0x38] sm:$0xff] %vm251_vm2, %v667_v6  ;;  %v681_v21 = vadd.f32 %v616_v15, %v305_v1  ;;  %v824_v22 = vadd.f32 %v1506_v60, %v785_v9  ;;  %v806_v23 = vadd.f32 %v1506_v60, %v767_v10  ;;  %v786_v24 = vmul.f32 %v1501_v50, %v747_v19  ;;  %v745_v26 = vld [vmem:[#allocation2 + $0x88] sm:$0xff] }
  0xf5   : > { %v768_v25 = vmul.f32 %v1501_v50, %v729_v20  ;;  %716 = vst.msk [vmem:[#allocation2 + $0xb8] sm:$0xff] %vm251_vm2, %v683_v13  ;;  %698 = vst.msk [vmem:[#allocation2 + $0x28] sm:$0xff] %vm251_vm2, %v665_v14  ;;  %v840_v27 = vmax.f32 %v808_v16, 0.0  ;;  %v822_v28 = vadd.f32 %v1506_v60, %v783_v17  ;;  %v809_v29 = vadd.f32 %v1506_v60, %v770_v18  ;;  %v294_v17 = vld [vmem:[#allocation2 + $0x50] sm:$0xff] }
  0xf6   : > { %v784_v30 = vmul.f32 %v1501_v50, %v745_v26  ;;  %714 = vst.msk [vmem:[#allocation2 + $0xa8] sm:$0xff] %vm251_vm2, %v681_v21  ;;  %v856_v31 = vmax.f32 %v824_v22, 0.0  ;;  %v838_v32 = vmax.f32 %v806_v23, 0.0  ;;  %v825_v33 = vadd.f32 %v1506_v60, %v786_v24  ;;  %v1538_v35 = vpop.f32.mrb[8].mxu0  ;;  %v310_v22 = vld [vmem:[#allocation2 + $0xd0] sm:$0xff]  ;;  %v292_v23 = vld [vmem:[#allocation2 + $0x40] sm:$0xff] }
  0xf7   : > { %v807_v34 = vadd.f32 %v1506_v60, %v768_v25  ;;  %v1196_v36 = vpack.c.bf16 %v840_v27, %v840_v27  ;;  %v854_v37 = vmax.f32 %v822_v28, 0.0  ;;  %v841_v38 = vmax.f32 %v809_v29, 0.0  ;;  %v1541_v40 = vpop.f32.mrb[8].mxu1  ;;  %v1543_v41 = vpop.f32.mrb[9].mxu0  ;;  %v308_v24 = vld [vmem:[#allocation2 + $0xc0] sm:$0xff] }
  0xf8   : > { %v823_v39 = vadd.f32 %v1506_v60, %v784_v30  ;;  %v1212_v42 = vpack.c.bf16 %v856_v31, %v856_v31  ;;  %v1194_v43 = vpack.c.bf16 %v838_v32, %v838_v32  ;;  %v857_v44 = vmax.f32 %v825_v33, 0.0  ;;  %v734_v46 = vld [vmem:[#allocation2 + $0x30] sm:$0xff]  ;;  %v1545_v47 = vpop.f32.mrb[9].mxu1  ;;  %v1547_v48 = vpop.f32.mrb[10].mxu0  ;;  %v295_v30 = vld [vmem:[#allocation2 + $0x58] sm:$0xff] }
  0xf9   : > { %v839_v45 = vmax.f32 %v807_v34, 0.0  ;;  %1001 = vst.msk [vmem:[%s1534_s9 + $0x8] sm:$0xf] %vm998_vm4, %v1196_v36  ;;  %v1210_v49 = vpack.c.bf16 %v854_v37, %v854_v37  ;;  %v1197_v51 = vpack.c.bf16 %v841_v38, %v841_v38  ;;  %v773_v53 = vmul.f32 %v1501_v50, %v734_v46  ;;  %v750_v54 = vld [vmem:[#allocation2 + $0xb0] sm:$0xff]  ;;  %v732_v55 = vld [vmem:[#allocation2 + $0x20] sm:$0xff]  ;;  %v1552_v56 = vpop.f32.mrb[10].mxu1 }
  0xfa   : > { %v855_v52 = vmax.f32 %v823_v39, 0.0  ;;  %v1554_v57 = vpop.f32.mrb[11].mxu0  ;;  %1017 = vst.msk [vmem:[%s1534_s9 + $0x48] sm:$0xf] %vm998_vm4, %v1212_v42  ;;  %999 = vst.msk [vmem:[%s1534_s9] sm:$0xf] %vm998_vm4, %v1194_v43  ;;  %v1213_v58 = vpack.c.bf16 %v857_v44, %v857_v44  ;;  %v789_v61 = vmul.f32 %v1501_v50, %v750_v54  ;;  %v771_v62 = vmul.f32 %v1501_v50, %v732_v55 }
  0xfb   : > { %v1195_v59 = vpack.c.bf16 %v839_v45, %v839_v45  ;;  %v748_v63 = vld [vmem:[#allocation2 + $0xa0] sm:$0xff]  ;;  %v735_v0 = vld [vmem:[#allocation2 + $0x38] sm:$0xff]  ;;  %v1562_v1 = vpop.f32.mrb[11].mxu1  ;;  %1015 = vst.msk [vmem:[%s1534_s9 + $0x40] sm:$0xf] %vm998_vm4, %v1210_v49  ;;  %v812_v3 = vadd.f32 %v1506_v60, %v773_v53  ;;  %v293_v39 = vld [vmem:[#allocation2 + $0x48] sm:$0xff] }
  0xfc   : > { %1002 = vst.msk [vmem:[%s1534_s9 + $0xc] sm:$0xf] %vm998_vm4, %v1197_v51  ;;  %v1211_v2 = vpack.c.bf16 %v855_v52, %v855_v52  ;;  %v787_v4 = vmul.f32 %v1501_v50, %v748_v63  ;;  %v774_v5 = vmul.f32 %v1501_v50, %v735_v0  ;;  %v751_v6 = vld [vmem:[#allocation2 + $0xb8] sm:$0xff]  ;;  %v733_v7 = vld [vmem:[#allocation2 + $0x28] sm:$0xff]  ;;  %1018 = vst.msk [vmem:[%s1534_s9 + $0x4c] sm:$0xf] %vm998_vm4, %v1213_v58 }
  0xfd   : > { %1000 = vst.msk [vmem:[%s1534_s9 + $0x4] sm:$0xf] %vm998_vm4, %v1195_v59  ;;  %v828_v8 = vadd.f32 %v1506_v60, %v789_v61  ;;  %v810_v9 = vadd.f32 %v1506_v60, %v771_v62  ;;  %v790_v10 = vmul.f32 %v1501_v50, %v751_v6  ;;  %v772_v11 = vmul.f32 %v1501_v50, %v733_v7  ;;  %v749_v12 = vld [vmem:[#allocation2 + $0xa8] sm:$0xff]  ;;  %v311_v31 = vld [vmem:[#allocation2 + $0xd8] sm:$0xff]  ;;  %v298_v52 = vld [vmem:[#allocation2 + $0x70] sm:$0xff] }
  0xfe   : > { %1016 = vst.msk [vmem:[%s1534_s9 + $0x44] sm:$0xf] %vm998_vm4, %v1211_v2  ;;  %v844_v13 = vmax.f32 %v812_v3, 0.0  ;;  %v826_v14 = vadd.f32 %v1506_v60, %v787_v4  ;;  %v813_v15 = vadd.f32 %v1506_v60, %v774_v5  ;;  %v788_v16 = vmul.f32 %v1501_v50, %v749_v12  ;;  %v1262_v25 = vpop.f32.mrb[12].mxu0  ;;  %v309_v42 = vld [vmem:[#allocation2 + $0xc8] sm:$0xff]  ;;  %v314_v53 = vld [vmem:[#allocation2 + $0xf0] sm:$0xff] }
  0xff   : > { %v860_v18 = vmax.f32 %v828_v8, 0.0  ;;  %v842_v19 = vmax.f32 %v810_v9, 0.0  ;;  %v829_v20 = vadd.f32 %v1506_v60, %v790_v10  ;;  %v811_v21 = vadd.f32 %v1506_v60, %v772_v11  ;;  %v1278_v32 = vpop.f32.mrb[12].mxu1  ;;  %v581_v33 = vpop.f32.mrb[13].mxu0  ;;  %v296_v54 = vld [vmem:[#allocation2 + $0x60] sm:$0xff]  ;;  %v299_v0 = vld [vmem:[#allocation2 + $0x78] sm:$0xff] }
 0x100   : > { %v1200_v26 = vpack.c.bf16 %v844_v13, %v844_v13  ;;  %v858_v27 = vmax.f32 %v826_v14, 0.0  ;;  %v845_v28 = vmax.f32 %v813_v15, 0.0  ;;  %v827_v29 = vadd.f32 %v1506_v60, %v788_v16  ;;  %v645_v43 = vpop.f32.mrb[13].mxu1  ;;  %v1263_v44 = vpop.f32.mrb[14].mxu0  ;;  %v315_v2 = vld [vmem:[#allocation2 + $0xf8] sm:$0xff]  ;;  %v297_v7 = vld [vmem:[#allocation2 + $0x68] sm:$0xff] }
 0x101   : > { %v1216_v34 = vpack.c.bf16 %v860_v18, %v860_v18  ;;  %v1198_v36 = vpack.c.bf16 %v842_v19, %v842_v19  ;;  %v861_v37 = vmax.f32 %v829_v20, 0.0  ;;  %v843_v38 = vmax.f32 %v811_v21, 0.0  ;;  %v1279_v55 = vpop.f32.mrb[14].mxu1  ;;  %v584_v58 = vpop.f32.mrb[15].mxu0 }
 0x102   : > { %1005 = vst.msk [vmem:[%s1534_s9 + $0x18] sm:$0xf] %vm998_vm4, %v1200_v26  ;;  %v1214_v45 = vpack.c.bf16 %v858_v27, %v858_v27  ;;  %v1201_v46 = vpack.c.bf16 %v845_v28, %v845_v28  ;;  %v859_v49 = vmax.f32 %v827_v29, 0.0  ;;  %v670_v51 = vadd.f32 %v1538_v35, %v294_v17  ;;  %v312_v35 = vld [vmem:[#allocation2 + $0xe0] sm:$0xff]  ;;  %v648_v3 = vpop.f32.mrb[15].mxu1 }
 0x103   : > { %1021 = vst.msk [vmem:[%s1534_s9 + $0x58] sm:$0xf] %vm998_vm4, %v1216_v34  ;;  %1003 = vst.msk [vmem:[%s1534_s9 + $0x10] sm:$0xf] %vm998_vm4, %v1198_v36  ;;  %v1217_v59 = vpack.c.bf16 %v861_v37, %v861_v37  ;;  %v1199_v61 = vpack.c.bf16 %v843_v38, %v843_v38  ;;  %v686_v62 = vadd.f32 %v1541_v40, %v310_v22 }
 0x104   : > { %v668_v63 = vadd.f32 %v1543_v41, %v292_v23  ;;  %1019 = vst.msk [vmem:[%s1534_s9 + $0x50] sm:$0xf] %vm998_vm4, %v1214_v45  ;;  %1006 = vst.msk [vmem:[%s1534_s9 + $0x1c] sm:$0xf] %vm998_vm4, %v1201_v46  ;;  %v1215_v4 = vpack.c.bf16 %v859_v49, %v859_v49  ;;  %v684_v5 = vadd.f32 %v1545_v47, %v308_v24  ;;  %v313_v41 = vld [vmem:[#allocation2 + $0xe8] sm:$0xff] }
 0x105   : > { %703 = vst.msk [vmem:[#allocation2 + $0x50] sm:$0xff] %vm251_vm2, %v670_v51  ;;  %v671_v6 = vadd.f32 %v1547_v48, %v295_v30  ;;  %v687_v40 = vadd.f32 %v1552_v56, %v311_v31  ;;  %719 = vst.msk [vmem:[#allocation2 + $0xd0] sm:$0xff] %vm251_vm2, %v686_v62  ;;  %v669_v8 = vadd.f32 %v1554_v57, %v293_v39 }
 0x106   : > { %1022 = vst.msk [vmem:[%s1534_s9 + $0x5c] sm:$0xf] %vm998_vm4, %v1217_v59  ;;  %1004 = vst.msk [vmem:[%s1534_s9 + $0x14] sm:$0xf] %vm998_vm4, %v1199_v61  ;;  %v685_v9 = vadd.f32 %v1562_v1, %v309_v42  ;;  %v674_v10 = vadd.f32 %v1262_v25, %v298_v52  ;;  %v690_v47 = vadd.f32 %v1278_v32, %v314_v53 }
 0x107   : > { %701 = vst.msk [vmem:[#allocation2 + $0x40] sm:$0xff] %vm251_vm2, %v668_v63  ;;  %717 = vst.msk [vmem:[#allocation2 + $0xc0] sm:$0xff] %vm251_vm2, %v684_v5  ;;  %v672_v48 = vadd.f32 %v581_v33, %v296_v54  ;;  %v688_v56 = vadd.f32 %v645_v43, %v312_v35  ;;  %v675_v11 = vadd.f32 %v1263_v44, %v299_v0 }
 0x108   : > { %1020 = vst.msk [vmem:[%s1534_s9 + $0x54] sm:$0xf] %vm998_vm4, %v1215_v4  ;;  %v691_v12 = vadd.f32 %v1279_v55, %v315_v2  ;;  %v673_v57 = vadd.f32 %v584_v58, %v297_v7  ;;  %v689_v1 = vadd.f32 %v648_v3, %v313_v41 }
 0x109   : > { %704 = vst.msk [vmem:[#allocation2 + $0x58] sm:$0xff] %vm251_vm2, %v671_v6  ;;  %720 = vst.msk [vmem:[#allocation2 + $0xd8] sm:$0xff] %vm251_vm2, %v687_v40 }
 0x10a   : > { %702 = vst.msk [vmem:[#allocation2 + $0x48] sm:$0xff] %vm251_vm2, %v669_v8  ;;  %718 = vst.msk [vmem:[#allocation2 + $0xc8] sm:$0xff] %vm251_vm2, %v685_v9 }
 0x10b   : > { %707 = vst.msk [vmem:[#allocation2 + $0x70] sm:$0xff] %vm251_vm2, %v674_v10  ;;  %723 = vst.msk [vmem:[#allocation2 + $0xf0] sm:$0xff] %vm251_vm2, %v690_v47 }
 0x10c   : > { %705 = vst.msk [vmem:[#allocation2 + $0x60] sm:$0xff] %vm251_vm2, %v672_v48  ;;  %721 = vst.msk [vmem:[#allocation2 + $0xe0] sm:$0xff] %vm251_vm2, %v688_v56  ;;  %v738_v13 = vld [vmem:[#allocation2 + $0x50] sm:$0xff] }
 0x10d   : > { %708 = vst.msk [vmem:[#allocation2 + $0x78] sm:$0xff] %vm251_vm2, %v675_v11  ;;  %724 = vst.msk [vmem:[#allocation2 + $0xf8] sm:$0xff] %vm251_vm2, %v691_v12  ;;  %v777_v14 = vmul.f32 %v1501_v50, %v738_v13  ;;  %v754_v15 = vld [vmem:[#allocation2 + $0xd0] sm:$0xff] }
 0x10e   : > { %706 = vst.msk [vmem:[#allocation2 + $0x68] sm:$0xff] %vm251_vm2, %v673_v57  ;;  %722 = vst.msk [vmem:[#allocation2 + $0xe8] sm:$0xff] %vm251_vm2, %v689_v1  ;;  %v736_v16 = vld [vmem:[#allocation2 + $0x40] sm:$0xff]  ;;  %v793_v17 = vmul.f32 %v1501_v50, %v754_v15 }
 0x10f   : > { %v775_v18 = vmul.f32 %v1501_v50, %v736_v16  ;;  %v752_v19 = vld [vmem:[#allocation2 + $0xc0] sm:$0xff]  ;;  %v816_v22 = vadd.f32 %v1506_v60, %v777_v14 }
 0x110   : > { %v739_v20 = vld [vmem:[#allocation2 + $0x58] sm:$0xff]  ;;  %v791_v23 = vmul.f32 %v1501_v50, %v752_v19  ;;  %v832_v28 = vadd.f32 %v1506_v60, %v793_v17 }
 0x111   : > { %v755_v21 = vld [vmem:[#allocation2 + $0xd8] sm:$0xff]  ;;  %v778_v24 = vmul.f32 %v1501_v50, %v739_v20  ;;  %v737_v26 = vld [vmem:[#allocation2 + $0x48] sm:$0xff]  ;;  %v814_v29 = vadd.f32 %v1506_v60, %v775_v18  ;;  %v848_v32 = vmax.f32 %v816_v22, 0.0 }
 0x112   : > { %v794_v25 = vmul.f32 %v1501_v50, %v755_v21  ;;  %v753_v27 = vld [vmem:[#allocation2 + $0xc8] sm:$0xff]  ;;  %v776_v30 = vmul.f32 %v1501_v50, %v737_v26  ;;  %v830_v33 = vadd.f32 %v1506_v60, %v791_v23  ;;  %v864_v37 = vmax.f32 %v832_v28, 0.0  ;;  %v742_v43 = vld [vmem:[#allocation2 + $0x70] sm:$0xff] }
 0x113   : > { %v792_v31 = vmul.f32 %v1501_v50, %v753_v27  ;;  %v817_v34 = vadd.f32 %v1506_v60, %v778_v24  ;;  %v846_v38 = vmax.f32 %v814_v29, 0.0  ;;  %v1204_v44 = vpack.c.bf16 %v848_v32, %v848_v32  ;;  %v758_v51 = vld [vmem:[#allocation2 + $0xf0] sm:$0xff]  ;;  %v740_v52 = vld [vmem:[#allocation2 + $0x60] sm:$0xff] }
 0x114   : > { %v833_v36 = vadd.f32 %v1506_v60, %v794_v25  ;;  %v815_v39 = vadd.f32 %v1506_v60, %v776_v30  ;;  %v862_v45 = vmax.f32 %v830_v33, 0.0  ;;  %v1220_v53 = vpack.c.bf16 %v864_v37, %v864_v37  ;;  %v756_v59 = vld [vmem:[#allocation2 + $0xe0] sm:$0xff]  ;;  %v743_v61 = vld [vmem:[#allocation2 + $0x78] sm:$0xff] }
 0x115   : > { %v831_v42 = vadd.f32 %v1506_v60, %v792_v31  ;;  %v849_v46 = vmax.f32 %v817_v34, 0.0  ;;  %v1202_v54 = vpack.c.bf16 %v846_v38, %v846_v38  ;;  %v759_v62 = vld [vmem:[#allocation2 + $0xf8] sm:$0xff]  ;;  %1009 = vst.msk [vmem:[%s1534_s9 + $0x28] sm:$0xf] %vm998_vm4, %v1204_v44  ;;  %v781_v2 = vmul.f32 %v1501_v50, %v742_v43  ;;  %v741_v3 = vld [vmem:[#allocation2 + $0x68] sm:$0xff] }
 0x116   : > { %v865_v49 = vmax.f32 %v833_v36, 0.0  ;;  %v847_v55 = vmax.f32 %v815_v39, 0.0  ;;  %v1218_v63 = vpack.c.bf16 %v862_v45, %v862_v45  ;;  %v757_v4 = vld [vmem:[#allocation2 + $0xe8] sm:$0xff]  ;;  %1025 = vst.msk [vmem:[%s1534_s9 + $0x68] sm:$0xf] %vm998_vm4, %v1220_v53  ;;  %v797_v40 = vmul.f32 %v1501_v50, %v758_v51 }
 0x117   : > { %v863_v58 = vmax.f32 %v831_v42, 0.0  ;;  %v1205_v35 = vpack.c.bf16 %v849_v46, %v849_v46  ;;  %1007 = vst.msk [vmem:[%s1534_s9 + $0x20] sm:$0xf] %vm998_vm4, %v1202_v54  ;;  %v779_v7 = vmul.f32 %v1501_v50, %v740_v52  ;;  %v820_v41 = vadd.f32 %v1506_v60, %v781_v2 }
 0x118   : > { %v1221_v0 = vpack.c.bf16 %v865_v49, %v865_v49  ;;  %v1203_v5 = vpack.c.bf16 %v847_v55, %v847_v55  ;;  %1023 = vst.msk [vmem:[%s1534_s9 + $0x60] sm:$0xf] %vm998_vm4, %v1218_v63  ;;  %v795_v8 = vmul.f32 %v1501_v50, %v756_v59  ;;  %v782_v9 = vmul.f32 %v1501_v50, %v743_v61 }
 0x119   : > { %v1219_v6 = vpack.c.bf16 %v863_v58, %v863_v58  ;;  %1010 = vst.msk [vmem:[%s1534_s9 + $0x2c] sm:$0xf] %vm998_vm4, %v1205_v35  ;;  %v798_v10 = vmul.f32 %v1501_v50, %v759_v62  ;;  %v836_v47 = vadd.f32 %v1506_v60, %v797_v40  ;;  %v818_v48 = vadd.f32 %v1506_v60, %v779_v7 }
 0x11a   : > { %1026 = vst.msk [vmem:[%s1534_s9 + $0x6c] sm:$0xf] %vm998_vm4, %v1221_v0  ;;  %1008 = vst.msk [vmem:[%s1534_s9 + $0x24] sm:$0xf] %vm998_vm4, %v1203_v5  ;;  %v780_v56 = vmul.f32 %v1501_v50, %v741_v3  ;;  %v796_v11 = vmul.f32 %v1501_v50, %v757_v4  ;;  %v852_v12 = vmax.f32 %v820_v41, 0.0  ;;  %v834_v57 = vadd.f32 %v1506_v60, %v795_v8 }
 0x11b   : > { %1024 = vst.msk [vmem:[%s1534_s9 + $0x64] sm:$0xf] %vm998_vm4, %v1219_v6  ;;  %v821_v1 = vadd.f32 %v1506_v60, %v782_v9  ;;  %v837_v13 = vadd.f32 %v1506_v60, %v798_v10  ;;  %v868_v14 = vmax.f32 %v836_v47, 0.0  ;;  %v850_v15 = vmax.f32 %v818_v48, 0.0 }
 0x11c   : > { %v819_v16 = vadd.f32 %v1506_v60, %v780_v56  ;;  %v835_v17 = vadd.f32 %v1506_v60, %v796_v11  ;;  %v1208_v18 = vpack.c.bf16 %v852_v12, %v852_v12  ;;  %v866_v19 = vmax.f32 %v834_v57, 0.0 }
 0x11d   : > { %v853_v50 = vmax.f32 %v821_v1, 0.0  ;;  %v869_v20 = vmax.f32 %v837_v13, 0.0  ;;  %v1224_v21 = vpack.c.bf16 %v868_v14, %v868_v14  ;;  %v1206_v22 = vpack.c.bf16 %v850_v15, %v850_v15 }
 0x11e   : > { %v851_v23 = vmax.f32 %v819_v16, 0.0  ;;  %v867_v24 = vmax.f32 %v835_v17, 0.0  ;;  %1013 = vst.msk [vmem:[%s1534_s9 + $0x38] sm:$0xf] %vm998_vm4, %v1208_v18  ;;  %v1222_v25 = vpack.c.bf16 %v866_v19, %v866_v19 }
 0x11f   : > { %v1209_v26 = vpack.c.bf16 %v853_v50, %v853_v50  ;;  %v1225_v27 = vpack.c.bf16 %v869_v20, %v869_v20  ;;  %1029 = vst.msk [vmem:[%s1534_s9 + $0x78] sm:$0xf] %vm998_vm4, %v1224_v21  ;;  %1011 = vst.msk [vmem:[%s1534_s9 + $0x30] sm:$0xf] %vm998_vm4, %v1206_v22 }
 0x120   : > { %v1207_v60 = vpack.c.bf16 %v851_v23, %v851_v23  ;;  %v1223_v28 = vpack.c.bf16 %v867_v24, %v867_v24  ;;  %1027 = vst.msk [vmem:[%s1534_s9 + $0x70] sm:$0xf] %vm998_vm4, %v1222_v25 }
 0x121   : > { %1014 = vst.msk [vmem:[%s1534_s9 + $0x3c] sm:$0xf] %vm998_vm4, %v1209_v26  ;;  %1030 = vst.msk [vmem:[%s1534_s9 + $0x7c] sm:$0xf] %vm998_vm4, %v1225_v27 }
 0x122   : > { %1012 = vst.msk [vmem:[%s1534_s9 + $0x34] sm:$0xf] %vm998_vm4, %v1207_v60  ;;  %1028 = vst.msk [vmem:[%s1534_s9 + $0x74] sm:$0xf] %vm998_vm4, %v1223_v28 }
 0x123 PF: > { %s14_s17 = sadd.s32 1, %s1350_s17   ;;  %s1706_s15 = smov %s1346_s16 }
 0x124   : > { %p11_p5 = scmp.ge.s32.totalorder %s14_s17, 4   ;;  %s1707_s16 = smov %s1709_s18 }
 0x126   :  { %13 = sbr.rel (!%p11_p5) target bundleno = 2 (0x2), region = 77 }

</bundles_post_ra>
